<compile_context>
chip_gen: v7x
topology: tpu7x:2x2x1
jax: 0.10.0
libtpu: 0.0.40
codegen_flags: <defaults>
</compile_context>

<pallas_src>
import jax
import jax.numpy as jnp
from jax.experimental import pallas as pl
from jax.experimental.pallas import tpu as pltpu
import numpy as np

# ----- small synthetic shapes consistent with the module -----
B, S, H = 2, 16, 32          # batch, sequence, hidden (bert.config.hidden_size)
V = 64                       # vocab size of the synthetic encoder stand-in
NUM_CLASSES = 2              # start/end feedforward out_features = 2
FUSED_C = 2 * NUM_CLASSES    # start + end classifiers fused -> 4 rows
LOSS_W0, LOSS_W1 = 1.0, 1.0  # self.loss_weight = [1.0, 1.0]
LEAKY_SLOPE = 0.01           # F.leaky_relu default negative_slope

LANE = 128
# Max rows per tile.  At real XLM-R sizes (H_PAD = 768/1024) a 512-row tile is
# ~1-2 MiB of bf16 activations -> the >=1 MiB-per-tile regime that reaches
# ~85% of HBM roofline; tiny tiles pay ~0.35 us per grid step.
MAX_TILE_N = 512

# Explicit scoped-VMEM limit (perf review): v5e defaults to only 16 MiB of its
# 128 MiB physical, v7x has 64 MiB physical / 32 MiB default.  The
# double-buffered working set at TILE_N=512, H_PAD=1024 is ~2.5 MiB, so 32 MiB
# leaves ample headroom and fits every generation.
VMEM_LIMIT_BYTES = 32 * 1024 * 1024


def _round_up(x, m):
    return (x + m - 1) // m * m


H_PAD = _round_up(H, LANE)   # at real XLM-R widths (768/1024) this is a no-op


def mrc_head_kernel(x_ref, w_ref, b_ref, coef_ref, lp_ref, nll_ref):
    """One N-tile of the MRC head, lane-dense (tokens on the 128-lane axis).

    x_ref   : [TILE_N, H_PAD] bf16  encoder hidden states (zero-padded)
    w_ref   : [4, H_PAD]      bf16  fused+transposed [w_start ; w_end], resident
    b_ref   : [4, 1]          f32   fused biases, resident
    coef_ref: [4, TILE_N]     f32   NLL coefficients (c0_s, c1_s, c0_e, c1_e);
                                    zero on padded tokens
    lp_ref  : [4, TILE_N]     f32   log-probs (lp0_s, lp1_s, lp0_e, lp1_e)
    nll_ref : [2, TILE_N]     f32   per-token weighted NLL (start row, end row)
    """
    # self.dropout(F.leaky_relu(h)) -- eval-mode dropout = identity.  Kept in
    # bf16 (v6e/v7x have bf16 VALU; v5e lowers via f32 internally) so no
    # [TILE_N, H_PAD] f32 copy is materialized in VMEM.
    # TODO(synk): training-mode dropout would need pltpu.prng_seed/prng_random_bits.
    x = x_ref[...]
    slope = jnp.asarray(LEAKY_SLOPE, dtype=x.dtype)
    x = jnp.where(x > 0, x, slope * x)

    # Fused start/end feedforward in transposed form (A @ B^T on the MXU), so
    # the token axis lands on the 128-lane dim for all downstream math/stores.
    logits = jax.lax.dot_general(
        w_ref[...], x, (((1,), (1,)), ((), ())),
        preferred_element_type=jnp.float32) + b_ref[...]          # [4, TILE_N]

    # F.log_softmax(dim=-1) per 2-class half via the stable softplus identity:
    # 1 exp + 1 log per pair on lane-dense [1, TILE_N] rows (EUP-friendly).
    d_s = logits[1:2, :] - logits[0:1, :]
    d_e = logits[3:4, :] - logits[2:3, :]
    t_s = jnp.log(1.0 + jnp.exp(-jnp.abs(d_s)))
    t_e = jnp.log(1.0 + jnp.exp(-jnp.abs(d_e)))
    lp1_s = jnp.minimum(d_s, 0.0) - t_s
    lp0_s = lp1_s - d_s
    lp1_e = jnp.minimum(d_e, 0.0) - t_e
    lp0_e = lp1_e - d_e
    lp_ref[0:1, :] = lp0_s
    lp_ref[1:2, :] = lp1_s
    lp_ref[2:3, :] = lp0_e
    lp_ref[3:4, :] = lp1_e

    # NLLLoss(weight, reduction='none') per token: -w[lab]*lp[lab]
    #   = c0*lp0 + c1*(lp1-lp0) = c0*lp0 + c1*d      (coef built in wrapper).
    # Emitted unreduced and summed in XLA after the call so the N axis carries
    # no resident accumulator and can be marked "parallel" (both v7x TCs).
    c = coef_ref[...]
    nll_ref[0:1, :] = c[0:1, :] * lp0_s + c[1:2, :] * d_s
    nll_ref[1:2, :] = c[2:3, :] * lp0_e + c[3:4, :] * d_e


def init_params(key):
    k_emb, k_ws, k_bs, k_we, k_be = jax.random.split(key, 5)
    bound = 1.0 / np.sqrt(H)  # nn.Linear default uniform bound
    return {
        # deterministic encoder stand-in (replaces AutoModel xlm-roberta-base)
        "embed": jax.random.normal(k_emb, (V, H), jnp.float32) * 0.02,
        "w_start": jax.random.uniform(k_ws, (H, NUM_CLASSES), jnp.float32,
                                      -bound, bound),
        "b_start": jax.random.uniform(k_bs, (1, NUM_CLASSES), jnp.float32,
                                      -bound, bound),
        "w_end": jax.random.uniform(k_we, (H, NUM_CLASSES), jnp.float32,
                                    -bound, bound),
        "b_end": jax.random.uniform(k_be, (1, NUM_CLASSES), jnp.float32,
                                    -bound, bound),
    }


@jax.jit
def mrc_ner_forward(params, tokens, mask, starts, ends):
    # TODO(synk): full pretrained XLM-R forward omitted; hidden states come
    # from a deterministic embedding lookup.  A real encoder should emit bf16
    # hidden states directly from its epilogue so this cast costs no HBM pass.
    hidden = params["embed"][tokens].astype(jnp.bfloat16)        # [B, S, H]
    N = B * S
    tile_n = min(MAX_TILE_N, _round_up(N, LANE))   # lane-dense, multiple of 128
    n_pad = _round_up(N, tile_n)
    grid_n = n_pad // tile_n

    x = hidden.reshape(N, H)
    # Pad only when needed: at real XLM-R widths (H multiple of 128) and
    # tile-aligned N this is a no-op, so no extra full-tensor HBM pass.
    if H_PAD != H or n_pad != N:
        x = jnp.pad(x, ((0, n_pad - N), (0, H_PAD - H)))

    # Fused + transposed classifier: rows = [start c0, start c1, end c0, end c1].
    w_t = jnp.concatenate([params["w_start"], params["w_end"]], axis=1).T  # [4, H]
    if H_PAD != H:
        w_t = jnp.pad(w_t, ((0, 0), (0, H_PAD - H)))
    w_t = w_t.astype(jnp.bfloat16)
    b_t = jnp.concatenate([params["b_start"], params["b_end"]],
                          axis=1).reshape(FUSED_C, 1).astype(jnp.float32)

    # NLL coefficients: per-token loss = c0*lp0 + c1*(lp1-lp0), with
    # c0 = -w[lab], c1 = -w[lab]*lab.  Zero on padded tokens.
    w_vec = jnp.array([LOSS_W0, LOSS_W1], jnp.float32)

    def _coef(lab):
        lab = lab.reshape(N).astype(jnp.int32)
        wl = w_vec[lab]
        return -wl, -wl * lab.astype(jnp.float32)

    c0s, c1s = _coef(starts)
    c0e, c1e = _coef(ends)
    coef = jnp.stack([c0s, c1s, c0e, c1e], axis=0)               # [4, N]
    if n_pad != N:
        coef = jnp.pad(coef, ((0, 0), (0, n_pad - N)))

    lp, nll = pl.pallas_call(
        mrc_head_kernel,
        out_shape=(
            jax.ShapeDtypeStruct((FUSED_C, n_pad), jnp.float32),  # log-probs
            jax.ShapeDtypeStruct((2, n_pad), jnp.float32),        # per-token NLL
        ),
        grid=(grid_n,),
        in_specs=[
            pl.BlockSpec((tile_n, H_PAD), lambda i: (i, 0)),      # hidden tile
            pl.BlockSpec((FUSED_C, H_PAD), lambda i: (0, 0)),     # resident weight
            pl.BlockSpec((FUSED_C, 1), lambda i: (0, 0)),         # resident bias
            pl.BlockSpec((FUSED_C, tile_n), lambda i: (0, i)),    # NLL coef tile
        ],
        out_specs=(
            pl.BlockSpec((FUSED_C, tile_n), lambda i: (0, i)),    # lane-dense lp
            pl.BlockSpec((2, tile_n), lambda i: (0, i)),          # lane-dense nll
        ),
        compiler_params=pltpu.CompilerParams(
            # No cross-step state -> independent tiles; "parallel" lets v7x
            # shard the N axis across both TensorCores (no effect on v5e/v6e).
            dimension_semantics=("parallel",),
            vmem_limit_bytes=VMEM_LIMIT_BYTES,
        ),
    )(x, w_t, b_t, coef)

    # Scalar loss reduction in XLA (8 B/token vs the kernel's ~2 KB/token read).
    start_loss = jnp.sum(nll[0]) / float(B)
    end_loss = jnp.sum(nll[1]) / float(B)

    start_scores = lp[0:NUM_CLASSES, :N].T.reshape(B, S, NUM_CLASSES)
    end_scores = lp[NUM_CLASSES:, :N].T.reshape(B, S, NUM_CLASSES)
    # mrc_decode tensor part: torch.argmax(scores, -1) * mask  (argmax is
    # invariant under log_softmax; exact ties resolve to class 0).
    start_preds = jnp.argmax(start_scores, axis=-1).astype(jnp.int32) * mask
    end_preds = jnp.argmax(end_scores, axis=-1).astype(jnp.int32) * mask

    return {
        "loss": start_loss + end_loss,
        "start_loss": start_loss,
        "end_loss": end_loss,
        "start_scores": start_scores,
        "end_scores": end_scores,
        "start_preds": start_preds,
        "end_preds": end_preds,
    }


def _reference(params, tokens, starts, ends):
    """Plain-JAX reference with the kernel's numerics (bf16 activations)."""
    xb = params["embed"][tokens].reshape(B * S, H).astype(jnp.bfloat16)
    slope = jnp.asarray(LEAKY_SLOPE, jnp.bfloat16)
    xb = jnp.where(xb > 0, xb, slope * xb)
    w_vec = jnp.array([LOSS_W0, LOSS_W1], jnp.float32)

    def head(wp, bp, lab):
        logits = jnp.dot(xb, wp.astype(jnp.bfloat16),
                         preferred_element_type=jnp.float32) + bp
        lp = jax.nn.log_softmax(logits, axis=-1)
        lab = lab.reshape(-1)
        loss = jnp.sum(-w_vec[lab] * lp[jnp.arange(B * S), lab]) / float(B)
        return lp, loss

    s_lp, s_loss = head(params["w_start"], params["b_start"], starts)
    e_lp, e_loss = head(params["w_end"], params["b_end"], ends)
    return s_lp, e_lp, s_loss + e_loss


if __name__ == "__main__":
    key = jax.random.PRNGKey(0)
    k_p, k_t, k_s, k_e = jax.random.split(key, 4)

    params = init_params(k_p)
    tokens = jax.random.randint(k_t, (B, S), 0, V, jnp.int32)
    starts = jax.random.randint(k_s, (B, S), 0, NUM_CLASSES, jnp.int32)
    ends = jax.random.randint(k_e, (B, S), 0, NUM_CLASSES, jnp.int32)
    mask = jnp.ones((B, S), jnp.int32).at[:, S - 2:].set(0)  # last 2 tokens padded

    out = mrc_ner_forward(params, tokens, mask, starts, ends)
    jax.block_until_ready(out)

    ref_s_lp, ref_e_lp, ref_loss = _reference(params, tokens, starts, ends)
    np.testing.assert_allclose(np.asarray(out["loss"]), np.asarray(ref_loss),
                               rtol=1e-4, atol=1e-4)
    np.testing.assert_allclose(
        np.asarray(out["start_scores"]).reshape(-1, NUM_CLASSES),
        np.asarray(ref_s_lp), rtol=1e-4, atol=1e-4)
    np.testing.assert_allclose(
        np.asarray(out["end_scores"]).reshape(-1, NUM_CLASSES),
        np.asarray(ref_e_lp), rtol=1e-4, atol=1e-4)
    print("KERNEL_OK")
</pallas_src>

<mosaic_0001>
module attributes {stable_mosaic.version = 11 : i64} {
  func.func @mrc_head_kernel(%arg0: i32, %arg1: memref<128x128xbf16, #tpu.memory_space<vmem>>, %arg2: memref<4x128xbf16, #tpu.memory_space<vmem>>, %arg3: memref<4x1xf32, #tpu.memory_space<vmem>>, %arg4: memref<4x128xf32, #tpu.memory_space<vmem>>, %arg5: memref<4x128xf32, #tpu.memory_space<vmem>>, %arg6: memref<2x128xf32, #tpu.memory_space<vmem>>) attributes {dimension_semantics = [#tpu.dimension_semantics<parallel>], iteration_bounds = array<i64: 1>, scalar_prefetch = 0 : i64, scratch_operands = 0 : i64, tpu.core_type = #tpu.core_type<tc>, window_params = [{transform_indices = @transform_0, window_bounds = array<i64: 128, 128>}, {pipeline_mode = #tpu.pipeline_mode<synchronous>, transform_indices = @transform_1, window_bounds = array<i64: 4, 128>}, {pipeline_mode = #tpu.pipeline_mode<synchronous>, transform_indices = @transform_2, window_bounds = array<i64: 4, 1>}, {transform_indices = @transform_3, window_bounds = array<i64: 4, 128>}, {transform_indices = @transform_4, window_bounds = array<i64: 4, 128>}, {transform_indices = @transform_5, window_bounds = array<i64: 2, 128>}]} {
    %c0 = arith.constant 0 : index
    %c0_0 = arith.constant 0 : index
    %0 = vector.load %arg1[%c0, %c0_0] : memref<128x128xbf16, #tpu.memory_space<vmem>>, vector<128x128xbf16>
    %cst = arith.constant 0.000000e+00 : bf16
    %1 = vector.broadcast %cst : bf16 to vector<128x128xbf16>
    %2 = arith.cmpf ogt, %0, %1 : vector<128x128xbf16>
    %cst_1 = arith.constant 1.000980e-02 : bf16
    %3 = vector.broadcast %cst_1 : bf16 to vector<128x128xbf16>
    %4 = arith.mulf %3, %0 : vector<128x128xbf16>
    %5 = arith.select %2, %0, %4 : vector<128x128xi1>, vector<128x128xbf16>
    %c0_2 = arith.constant 0 : index
    %c0_3 = arith.constant 0 : index
    %6 = vector.load %arg2[%c0_2, %c0_3] : memref<4x128xbf16, #tpu.memory_space<vmem>>, vector<4x128xbf16>
    %cst_4 = arith.constant dense<0.000000e+00> : vector<4x128xf32>
    %7 = tpu.matmul %6, %5, %cst_4 {dimension_numbers = #tpu.dot_dimension_numbers<[1], [1], [0], [0], [0, 0, 1, 0], [], []>} : vector<4x128xbf16>, vector<128x128xbf16>, vector<4x128xf32> -> vector<4x128xf32>
    %c0_5 = arith.constant 0 : index
    %c0_6 = arith.constant 0 : index
    %8 = vector.load %arg3[%c0_5, %c0_6] : memref<4x1xf32, #tpu.memory_space<vmem>>, vector<4x1xf32>
    %9 = vector.broadcast %8 : vector<4x1xf32> to vector<4x128xf32>
    %10 = arith.addf %7, %9 : vector<4x128xf32>
    %11 = vector.extract_strided_slice %10 {offsets = [1, 0], sizes = [1, 128], strides = [1, 1]} : vector<4x128xf32> to vector<1x128xf32>
    %12 = vector.extract_strided_slice %10 {offsets = [0, 0], sizes = [1, 128], strides = [1, 1]} : vector<4x128xf32> to vector<1x128xf32>
    %13 = arith.subf %11, %12 : vector<1x128xf32>
    %14 = vector.extract_strided_slice %10 {offsets = [3, 0], sizes = [1, 128], strides = [1, 1]} : vector<4x128xf32> to vector<1x128xf32>
    %15 = vector.extract_strided_slice %10 {offsets = [2, 0], sizes = [1, 128], strides = [1, 1]} : vector<4x128xf32> to vector<1x128xf32>
    %16 = arith.subf %14, %15 : vector<1x128xf32>
    %17 = math.absf %13 : vector<1x128xf32>
    %cst_7 = arith.constant 0.000000e+00 : f32
    %18 = vector.broadcast %cst_7 : f32 to vector<1x128xf32>
    %19 = arith.subf %18, %17 : vector<1x128xf32>
    %20 = math.exp %19 : vector<1x128xf32>
    %cst_8 = arith.constant 1.000000e+00 : f32
    %21 = vector.broadcast %cst_8 : f32 to vector<1x128xf32>
    %22 = arith.addf %21, %20 : vector<1x128xf32>
    %23 = math.log %22 : vector<1x128xf32>
    %24 = math.absf %16 : vector<1x128xf32>
    %cst_9 = arith.constant 0.000000e+00 : f32
    %25 = vector.broadcast %cst_9 : f32 to vector<1x128xf32>
    %26 = arith.subf %25, %24 : vector<1x128xf32>
    %27 = math.exp %26 : vector<1x128xf32>
    %cst_10 = arith.constant 1.000000e+00 : f32
    %28 = vector.broadcast %cst_10 : f32 to vector<1x128xf32>
    %29 = arith.addf %28, %27 : vector<1x128xf32>
    %30 = math.log %29 : vector<1x128xf32>
    %cst_11 = arith.constant 0.000000e+00 : f32
    %31 = vector.broadcast %cst_11 : f32 to vector<1x128xf32>
    %32 = arith.minimumf %13, %31 : vector<1x128xf32>
    %33 = arith.subf %32, %23 : vector<1x128xf32>
    %34 = arith.subf %33, %13 : vector<1x128xf32>
    %cst_12 = arith.constant 0.000000e+00 : f32
    %35 = vector.broadcast %cst_12 : f32 to vector<1x128xf32>
    %36 = arith.minimumf %16, %35 : vector<1x128xf32>
    %37 = arith.subf %36, %30 : vector<1x128xf32>
    %38 = arith.subf %37, %16 : vector<1x128xf32>
    %c0_13 = arith.constant 0 : index
    %c0_14 = arith.constant 0 : index
    %39 = vector.load %arg5[%c0_13, %c0_14] : memref<4x128xf32, #tpu.memory_space<vmem>>, vector<1x128xf32>
    tpu.vector_store %arg5[%c0_13, %c0_14], %34 {strides = array<i32>} : memref<4x128xf32, #tpu.memory_space<vmem>>, vector<1x128xf32>,
    %c1 = arith.constant 1 : index
    %c0_15 = arith.constant 0 : index
    %40 = vector.load %arg5[%c1, %c0_15] : memref<4x128xf32, #tpu.memory_space<vmem>>, vector<1x128xf32>
    tpu.vector_store %arg5[%c1, %c0_15], %33 {strides = array<i32>} : memref<4x128xf32, #tpu.memory_space<vmem>>, vector<1x128xf32>,
    %c2 = arith.constant 2 : index
    %c0_16 = arith.constant 0 : index
    %41 = vector.load %arg5[%c2, %c0_16] : memref<4x128xf32, #tpu.memory_space<vmem>>, vector<1x128xf32>
    tpu.vector_store %arg5[%c2, %c0_16], %38 {strides = array<i32>} : memref<4x128xf32, #tpu.memory_space<vmem>>, vector<1x128xf32>,
    %c3 = arith.constant 3 : index
    %c0_17 = arith.constant 0 : index
    %42 = vector.load %arg5[%c3, %c0_17] : memref<4x128xf32, #tpu.memory_space<vmem>>, vector<1x128xf32>
    tpu.vector_store %arg5[%c3, %c0_17], %37 {strides = array<i32>} : memref<4x128xf32, #tpu.memory_space<vmem>>, vector<1x128xf32>,
    %c0_18 = arith.constant 0 : index
    %c0_19 = arith.constant 0 : index
    %43 = vector.load %arg4[%c0_18, %c0_19] : memref<4x128xf32, #tpu.memory_space<vmem>>, vector<4x128xf32>
    %44 = vector.extract_strided_slice %43 {offsets = [0, 0], sizes = [1, 128], strides = [1, 1]} : vector<4x128xf32> to vector<1x128xf32>
    %45 = arith.mulf %44, %34 : vector<1x128xf32>
    %46 = vector.extract_strided_slice %43 {offsets = [1, 0], sizes = [1, 128], strides = [1, 1]} : vector<4x128xf32> to vector<1x128xf32>
    %47 = arith.mulf %46, %13 : vector<1x128xf32>
    %48 = arith.addf %45, %47 : vector<1x128xf32>
    %c0_20 = arith.constant 0 : index
    %c0_21 = arith.constant 0 : index
    %49 = vector.load %arg6[%c0_20, %c0_21] : memref<2x128xf32, #tpu.memory_space<vmem>>, vector<1x128xf32>
    tpu.vector_store %arg6[%c0_20, %c0_21], %48 {strides = array<i32>} : memref<2x128xf32, #tpu.memory_space<vmem>>, vector<1x128xf32>,
    %50 = vector.extract_strided_slice %43 {offsets = [2, 0], sizes = [1, 128], strides = [1, 1]} : vector<4x128xf32> to vector<1x128xf32>
    %51 = arith.mulf %50, %38 : vector<1x128xf32>
    %52 = vector.extract_strided_slice %43 {offsets = [3, 0], sizes = [1, 128], strides = [1, 1]} : vector<4x128xf32> to vector<1x128xf32>
    %53 = arith.mulf %52, %16 : vector<1x128xf32>
    %54 = arith.addf %51, %53 : vector<1x128xf32>
    %c1_22 = arith.constant 1 : index
    %c0_23 = arith.constant 0 : index
    %55 = vector.load %arg6[%c1_22, %c0_23] : memref<2x128xf32, #tpu.memory_space<vmem>>, vector<1x128xf32>
    tpu.vector_store %arg6[%c1_22, %c0_23], %54 {strides = array<i32>} : memref<2x128xf32, #tpu.memory_space<vmem>>, vector<1x128xf32>,
    return
  }
  func.func @transform_0(%arg0: i32) -> (i32, i32) {
    %c0_i32 = arith.constant 0 : i32
    %c0_i32_0 = arith.constant 0 : i32
    return %arg0, %c0_i32 : i32, i32
  }
  func.func @transform_1(%arg0: i32) -> (i32, i32) {
    %c0_i32 = arith.constant 0 : i32
    %c0_i32_0 = arith.constant 0 : i32
    %c0_i32_1 = arith.constant 0 : i32
    return %c0_i32, %c0_i32_0 : i32, i32
  }
  func.func @transform_2(%arg0: i32) -> (i32, i32) {
    %c0_i32 = arith.constant 0 : i32
    %c0_i32_0 = arith.constant 0 : i32
    %c0_i32_1 = arith.constant 0 : i32
    return %c0_i32, %c0_i32_0 : i32, i32
  }
  func.func @transform_3(%arg0: i32) -> (i32, i32) {
    %c0_i32 = arith.constant 0 : i32
    %c0_i32_0 = arith.constant 0 : i32
    return %c0_i32, %arg0 : i32, i32
  }
  func.func @transform_4(%arg0: i32) -> (i32, i32) {
    %c0_i32 = arith.constant 0 : i32
    %c0_i32_0 = arith.constant 0 : i32
    return %c0_i32, %arg0 : i32, i32
  }
  func.func @transform_5(%arg0: i32) -> (i32, i32) {
    %c0_i32 = arith.constant 0 : i32
    %c0_i32_0 = arith.constant 0 : i32
    return %c0_i32, %arg0 : i32, i32
  }
}

</mosaic_0001>

<bundles_post_ra>
// kernel: mrc_ner_forward.1
= control target key start
LH: loop header
LB: loop body
LE: loop exit
PB: predicated region body
PF: predicated region fallthrough
CT: control target
= control target key end

     0   :  { %v263_v0 = vmov 0.0   ;;  %vm264_vm0 = vmmov 0   ;;  %v265_v6 = vmov 0   ;;  %s374_s0 = inlined_call_operand.vmem [shape: bf16[128,128], index: 0, kind: input, shape index: {}]   ;;  %s375_s2 = inlined_call_operand.vmem [shape: f32[4,1], index: 2, kind: input, shape index: {}]   ;;  %s376_s1 = inlined_call_operand.vmem [shape: bf16[4,128], index: 1, kind: input, shape index: {}]   ;;  %s377_s3 = inlined_call_operand.vmem [shape: f32[4,128], index: 3, kind: input, shape index: {}]   ;;  %s378_s4 = inlined_call_operand.vmem [shape: f32[4,128], index: 4, kind: output, shape index: {0}]   ;;  %s379_s5 = inlined_call_operand.vmem [shape: f32[2,128], index: 5, kind: output, shape index: {1}]  }
   0x1   :  { %235 = vmatprep.subr.bf16.mxu0 %v263_v0  ;;  %v21_v1 = vld [vmem:[%s374_s0] sm:$0xf]  ;;  %v22_v2 = vld [vmem:[%s374_s0 + $0x4] sm:$0xf]  ;;  %v23_v3 = vld [vmem:[%s374_s0 + $0x8] sm:$0xf]  ;;  %251 = vmatprep.mubr.msk.bf16.mxu0 %vm264_vm0, %v263_v0 }
   0x2   :  { %vm37_vm1 = vcmp.gt.bf16.partialorder %v21_v1, 0  ;;  %vm38_vm2 = vcmp.gt.bf16.partialorder %v22_v2, 0  ;;  %v53_v4 = vmul.bf16 1009007652, %v21_v1  ;;  %v54_v5 = vmul.bf16 1009007652, %v22_v2  ;;  %258 = vset.pattern.permute.xlu0 %v265_v6 }
   0x3   :  { %v24_v7 = vld [vmem:[%s374_s0 + $0xc] sm:$0xf]  ;;  %v55_v10 = vmul.bf16 1009007652, %v23_v3  ;;  %vm39_vm3 = vcmp.gt.bf16.partialorder %v23_v3, 0 }
   0x4   :  { %v69_v8 = vsel %vm37_vm1, %v21_v1, %v53_v4  ;;  %v70_v9 = vsel %vm38_vm2, %v22_v2, %v54_v5  ;;  %v56_v11 = vmul.bf16 1009007652, %v24_v7  ;;  %vm40_vm4 = vcmp.gt.bf16.partialorder %v24_v7, 0  ;;  %v25_v15 = vld [vmem:[%s374_s0 + $0x10] sm:$0xf] }
   0x5   :  { %v218_v12 = vcombine.low %v69_v8, %v70_v9  ;;  %v71_v13 = vsel %vm39_vm3, %v23_v3, %v55_v10  ;;  %v26_v16 = vld [vmem:[%s374_s0 + $0x14] sm:$0xf]  ;;  %v57_v18 = vmul.bf16 1009007652, %v25_v15  ;;  %vm41_vm5 = vcmp.gt.bf16.partialorder %v25_v15, 0 }
   0x6   :  { %v72_v14 = vsel %vm40_vm4, %v24_v7, %v56_v11  ;;  %v58_v19 = vmul.bf16 1009007652, %v26_v16  ;;  %vm42_vm6 = vcmp.gt.bf16.partialorder %v26_v16, 0  ;;  %v27_v22 = vld [vmem:[%s374_s0 + $0x18] sm:$0xf] }
   0x7   :  { %236 = vmatpush3.bf16.xpose.msra.mxu0 %v218_v12  ;;  %v219_v17 = vcombine.low %v71_v13, %v72_v14  ;;  %v73_v20 = vsel %vm41_vm5, %v25_v15, %v57_v18  ;;  %v28_v23 = vld [vmem:[%s374_s0 + $0x1c] sm:$0xf]  ;;  %v86_v24 = vld [vmem:[%s375_s2] sm:$0xf]  ;;  %v59_v26 = vmul.bf16 1009007652, %v27_v22 }
   0x8   :  { %237 = vmatprep.subr.bf16.mxu0 %v263_v0  ;;  %v74_v21 = vsel %vm42_vm6, %v26_v16, %v58_v19  ;;  %89 = vperm.xlu0 %258, %v86_v24   ;;  %v60_v27 = vmul.bf16 1009007652, %v28_v23  ;;  %vm43_vm7 = vcmp.gt.bf16.partialorder %v27_v22, 0  ;;  %vm44_vm8 = vcmp.gt.bf16.partialorder %v28_v23, 0  ;;  %v29_v30 = vld [vmem:[%s374_s0 + $0x20] sm:$0xf] }
   0x9   :  { %v220_v25 = vcombine.low %v73_v20, %v74_v21  ;;  %v75_v28 = vsel %vm43_vm7, %v27_v22, %v59_v26  ;;  %v30_v31 = vld [vmem:[%s374_s0 + $0x24] sm:$0xf]  ;;  %v61_v33 = vmul.bf16 1009007652, %v29_v30  ;;  %vm45_vm9 = vcmp.gt.bf16.partialorder %v29_v30, 0 }
   0xa   :  { %v76_v29 = vsel %vm44_vm8, %v28_v23, %v60_v27  ;;  %v62_v34 = vmul.bf16 1009007652, %v30_v31  ;;  %vm46_vm10 = vcmp.gt.bf16.partialorder %v30_v31, 0  ;;  %v31_v37 = vld [vmem:[%s374_s0 + $0x28] sm:$0xf] }
   0xb   :  { %v221_v32 = vcombine.low %v75_v28, %v76_v29  ;;  %v77_v35 = vsel %vm45_vm9, %v29_v30, %v61_v33  ;;  %v32_v38 = vld [vmem:[%s374_s0 + $0x2c] sm:$0xf]  ;;  %v63_v40 = vmul.bf16 1009007652, %v31_v37  ;;  %vm47_vm11 = vcmp.gt.bf16.partialorder %v31_v37, 0 }
   0xc   :  { %v78_v36 = vsel %vm46_vm10, %v30_v31, %v62_v34  ;;  %v64_v41 = vmul.bf16 1009007652, %v32_v38  ;;  %vm48_vm12 = vcmp.gt.bf16.partialorder %v32_v38, 0  ;;  %v33_v44 = vld [vmem:[%s374_s0 + $0x30] sm:$0xf] }
   0xd   :  { %v222_v39 = vcombine.low %v77_v35, %v78_v36  ;;  %v79_v42 = vsel %vm47_vm11, %v31_v37, %v63_v40  ;;  %v34_v45 = vld [vmem:[%s374_s0 + $0x34] sm:$0xf]  ;;  %v65_v47 = vmul.bf16 1009007652, %v33_v44  ;;  %vm49_vm13 = vcmp.gt.bf16.partialorder %v33_v44, 0 }
   0xe   :  { %v80_v43 = vsel %vm48_vm12, %v32_v38, %v64_v41  ;;  %v66_v48 = vmul.bf16 1009007652, %v34_v45  ;;  %vm50_vm14 = vcmp.gt.bf16.partialorder %v34_v45, 0  ;;  %v35_v51 = vld [vmem:[%s374_s0 + $0x38] sm:$0xf] }
   0xf   :  { %238 = vmatpush3.bf16.xpose.msra.mxu0 %v219_v17  ;;  %v223_v46 = vcombine.low %v79_v42, %v80_v43  ;;  %v81_v49 = vsel %vm49_vm13, %v33_v44, %v65_v47  ;;  %v36_v52 = vld [vmem:[%s374_s0 + $0x3c] sm:$0xf]  ;;  %v67_v54 = vmul.bf16 1009007652, %v35_v51  ;;  %vm51_vm15 = vcmp.gt.bf16.partialorder %v35_v51, 0 }
  0x10   :  { %239 = vmatprep.subr.bf16.mxu0 %v263_v0  ;;  %v82_v50 = vsel %vm50_vm14, %v34_v45, %v66_v48  ;;  %v68_v55 = vmul.bf16 1009007652, %v36_v52  ;;  %vm52_vm0 = vcmp.gt.bf16.partialorder %v36_v52, 0  ;;  %v85_v59 = vld [vmem:[%s376_s1] sm:$0x3] }
  0x11   :  { %v224_v53 = vcombine.low %v81_v49, %v82_v50  ;;  %v83_v56 = vsel %vm51_vm15, %v35_v51, %v67_v54  ;;  %v198_v12 = vld [vmem:[%s377_s3] sm:$0xf] }
  0x12   :  { %v84_v57 = vsel %vm52_vm0, %v36_v52, %v68_v55 }
  0x13   :  { %v225_v58 = vcombine.low %v83_v56, %v84_v57 }
  0x17   :  { %240 = vmatpush3.bf16.xpose.msra.mxu0 %v220_v25 }
  0x18   :  { %241 = vmatprep.subr.bf16.mxu0 %v263_v0 }
  0x1f   :  { %242 = vmatpush3.bf16.xpose.msra.mxu0 %v221_v32 }
  0x20   :  { %243 = vmatprep.subr.bf16.mxu0 %v263_v0 }
  0x27   :  { %244 = vmatpush3.bf16.xpose.msra.mxu0 %v222_v39 }
  0x28   :  { %245 = vmatprep.subr.bf16.mxu0 %v263_v0 }
  0x2f   :  { %246 = vmatpush3.bf16.xpose.msra.mxu0 %v223_v46 }
  0x30   :  { %247 = vmatprep.subr.bf16.mxu0 %v263_v0 }
  0x37   :  { %248 = vmatpush3.bf16.xpose.msra.mxu0 %v224_v53 }
  0x38   :  { %249 = vmatprep.subr.bf16.mxu0 %v263_v0 }
  0x3f   :  { %250 = vmatpush3.bf16.xpose.msra.mxu0 %v225_v58 }
  0x46   :  { %252 = vmatmul.mubr.bf16.vlgmr.msra.gmra.mrb[0].mxu0 %v85_v59 }
  0x87   :  { %v90_v60 = vpop.permute.xlu0 %89 }
 0x119   :  { %v174_v61 = vpop.f32.mrb[0].mxu0 }
 0x11a   :  { %v175_v62 = vadd.f32 %v174_v61, %v90_v60  ;;  %v253_v63 = vpop.f32.mrb[1].mxu0 }
 0x11b   :  { %v177_v1 = vpop.f32.mrb[2].mxu0 }
 0x11c   :  { %v181_v2 = vrot.slane %v175_v62, 7  ;;  %v254_v3 = vpop.f32.mrb[3].mxu0 }
 0x11e   :  { %v183_v4 = vsub.f32 %v175_v62, %v181_v2 }
 0x120   :  { %v184_v5 = vand.u32 2147483647, %v183_v4  ;;  %v191_v11 = vmin.f32 %v183_v4, 0.0  ;;  %v203_v15 = vmul.f32 %v198_v12, %v183_v4 }
 0x122   :  { %v185_v6 = vsub.f32 0.0, %v184_v5  ;;  %v205_v18 = vrot.slane %v203_v15, 1 }
 0x124   :  { %v186_v0 = vmul.f32 1.442695, %v185_v6 }
 0x126   :  { %259 = vpow2.f32 %v186_v0 }
 0x130   :  { %v260_v7 = vpop.eup %259 }
 0x131   :  { %v188_v8 = vadd.f32 1.0, %v260_v7 }
 0x133   :  { %261 = vlog2.f32 %v188_v8 }
 0x13d   :  { %v262_v9 = vpop.eup %261 }
 0x13e   :  { %v190_v10 = vmul.f32 0.6931472, %v262_v9 }
 0x140   :  { %v192_v13 = vsub.f32 %v191_v11, %v190_v10 }
 0x142   :  { %v193_v14 = vsub.f32 %v192_v13, %v183_v4  ;;  %195 = vst [vmem:[%s378_s4] sm:$0xa] %v192_v13  }
 0x144   :  { %194 = vst [vmem:[%s378_s4 - $0x1] sm:$0xa] %v193_v14   ;;  %v200_v16 = vrot.slane %v193_v14, 1 }
 0x146   :  { %v202_v17 = vmul.f32 %v200_v16, %v198_v12 }
 0x148   :  { %v207_v19 = vadd.f32 %v205_v18, %v202_v17 }
 0x14a   :  { %208 = vst [vmem:[%s379_s5] sm:$0x1] %v207_v19  ;;  %209 = vst [vmem:[%s379_s5 - $0x1] sm:$0x4] %v207_v19 }

</bundles_post_ra>
